<compile_context>
chip_gen: v6e
topology: v6e:2x2x1
jax: 0.10.0
libtpu: 0.0.40
codegen_flags: <defaults>
</compile_context>

<pallas_src>
import jax
import jax.numpy as jnp
from jax.experimental import pallas as pl
from jax.experimental.pallas import tpu as pltpu


# ----------------------------- Pallas kernel ------------------------------ #
def _fused_stack_kernel(x_ref, w_ref, b_ref, o_ref, h_ref):
    """One grid step = (row-tile i, layer l).

    x_ref : (tm, H)     f32   input row tile (DMA'd once per i, reused over l)
    w_ref : (1, H, H)   bf16  layer-l weight (prefetched during layer l-1)
    b_ref : (1, 1, H)   f32   layer-l bias
    o_ref : (1, tm, H)  f32   layer-l activation (the recorded intermediate)
    h_ref : (tm, H)     f32   VMEM scratch carrying the running activation
    """
    layer = pl.program_id(1)

    # Layer 0: load this row tile's input into the resident activation.
    @pl.when(layer == 0)
    def _():
        h_ref[...] = x_ref[...].astype(jnp.float32)

    # bf16 operands on the MXU, f32 accumulation.
    acc = jnp.dot(
        h_ref[...].astype(jnp.bfloat16),
        w_ref[0],
        preferred_element_type=jnp.float32,
    )
    acc = acc + b_ref[0]                       # (1, H) broadcast over rows
    h = jax.nn.gelu(acc, approximate=True)     # tanh GELU -> EUP slot

    h_ref[...] = h                             # carry to layer l+1 (VMEM only)
    o_ref[0] = h.astype(o_ref.dtype)           # emit intermediate for layer l


# ------------------------------- wrapper ----------------------------------- #
def _pick_row_tile(m):
    """Largest MXU-friendly row tile: whole M if it fits, else a big divisor."""
    if m <= 512:
        return m
    for tm in (512, 256, 128, 64, 32, 16, 8):
        if m % tm == 0:
            return tm
    return m


def fused_linear_gelu_stack(x2d, w_stack, b_stack):
    """All L layers of gelu(x @ W_l + b_l) in one pallas_call.

    x2d:     [M, H] f32
    w_stack: [L, H, H]
    b_stack: [L, H]
    returns: [L, M, H] f32 -- activation after every layer.
    """
    M, H = x2d.shape
    L, Hw, Hn = w_stack.shape
    assert H == Hw and H == Hn

    tm = _pick_row_tile(M)
    assert M % tm == 0, "row count must be a multiple of the row tile"

    w_bf16 = w_stack.astype(jnp.bfloat16)               # MXU-native operands
    b3 = b_stack.reshape(L, 1, H).astype(jnp.float32)   # f32 epilogue bias

    return pl.pallas_call(
        _fused_stack_kernel,
        out_shape=jax.ShapeDtypeStruct((L, M, H), x2d.dtype),
        grid_spec=pltpu.PrefetchScalarGridSpec(
            num_scalar_prefetch=0,
            grid=(M // tm, L),                            # layers innermost
            in_specs=[
                # input row tile: block index constant over l -> DMA'd once per i
                pl.BlockSpec((tm, H), lambda i, l: (i, 0)),
                # per-layer weight: next layer's block prefetched while this runs
                pl.BlockSpec((1, H, H), lambda i, l: (l, 0, 0)),
                # per-layer bias
                pl.BlockSpec((1, 1, H), lambda i, l: (l, 0, 0)),
            ],
            # stacked intermediates: one (tm, H) slab per (layer, row-tile)
            out_specs=pl.BlockSpec((1, tm, H), lambda i, l: (l, i, 0)),
            scratch_shapes=[pltpu.VMEM((tm, H), jnp.float32)],
        ),
        compiler_params=pltpu.CompilerParams(
            dimension_semantics=("parallel", "arbitrary"),
        ),
    )(x2d, w_bf16, b3)


# --------------------- IntermediateSequential (JAX) ----------------------- #
class IntermediateSequential:
    """JAX/Pallas port of model/transformer.py::IntermediateSequential,
    specialized to a stack of fused (Linear + GELU) layers executed by ONE
    Pallas kernel that keeps the running activation resident in VMEM and
    emits every layer's output (the recorded intermediates)."""

    def __init__(self, w_stack, b_stack, *, return_intermediate=True):
        self.w_stack = w_stack
        self.b_stack = b_stack
        self.return_intermediate = return_intermediate

    def __call__(self, x):
        B, S, H = x.shape
        L = self.w_stack.shape[0]
        acts = fused_linear_gelu_stack(
            x.reshape(B * S, H), self.w_stack, self.b_stack
        ).reshape(L, B, S, H)
        output = acts[L - 1]
        if not self.return_intermediate:
            return output
        intermediate_outputs = {str(i): acts[i] for i in range(L)}
        return output, intermediate_outputs


# ----------------------------- pure-JAX reference -------------------------- #
def _reference_stack(x2d, w_stack, b_stack):
    outs = []
    h = x2d.astype(jnp.float32)
    for l in range(w_stack.shape[0]):
        acc = jnp.dot(
            h.astype(jnp.bfloat16),
            w_stack[l].astype(jnp.bfloat16),
            preferred_element_type=jnp.float32,
        )
        h = jax.nn.gelu(acc + b_stack[l].astype(jnp.float32), approximate=True)
        outs.append(h)
    return jnp.stack(outs, 0)


# --------------------------------- main ------------------------------------ #
if __name__ == "__main__":
    BATCH, SEQ, HIDDEN = 2, 8, 128
    NUM_LAYERS = 3

    key = jax.random.PRNGKey(0)
    kx, kw, kb = jax.random.split(key, 3)

    x = jax.random.normal(kx, (BATCH, SEQ, HIDDEN), dtype=jnp.float32)

    scale = 1.0 / jnp.sqrt(HIDDEN)
    w_stack = jax.random.uniform(
        kw, (NUM_LAYERS, HIDDEN, HIDDEN), jnp.float32, -scale, scale
    )
    b_stack = jax.random.uniform(
        kb, (NUM_LAYERS, HIDDEN), jnp.float32, -scale, scale
    )

    model = IntermediateSequential(w_stack, b_stack, return_intermediate=True)

    output, intermediates = model(x)
    output = jax.block_until_ready(output)
    for v in intermediates.values():
        jax.block_until_ready(v)

    # Structural semantics of IntermediateSequential.forward.
    assert output.shape == (BATCH, SEQ, HIDDEN)
    assert sorted(intermediates.keys()) == sorted(
        str(i) for i in range(NUM_LAYERS)
    )
    assert bool(jnp.all(intermediates[str(NUM_LAYERS - 1)] == output))

    # Numerical check vs a pure-JAX reference using the same precision recipe.
    ref = _reference_stack(x.reshape(BATCH * SEQ, HIDDEN), w_stack, b_stack)
    ref = ref.reshape(NUM_LAYERS, BATCH, SEQ, HIDDEN)
    for i in range(NUM_LAYERS):
        assert jnp.allclose(
            intermediates[str(i)], ref[i], atol=2e-2, rtol=2e-2
        ), f"layer {i} mismatch"

    print("KERNEL_OK")
</pallas_src>

<mosaic_0001>
module attributes {stable_mosaic.version = 11 : i64} {
  func.func @_fused_stack_kernel(%arg0: i32, %arg1: i32, %arg2: memref<16x128xf32, #tpu.memory_space<vmem>>, %arg3: memref<1x128x128xbf16, #tpu.memory_space<vmem>>, %arg4: memref<1x1x128xf32, #tpu.memory_space<vmem>>, %arg5: memref<1x16x128xf32, #tpu.memory_space<vmem>>, %arg6: memref<16x128xf32, #tpu.memory_space<vmem>>) attributes {dimension_semantics = [#tpu.dimension_semantics<parallel>, #tpu.dimension_semantics<arbitrary>], iteration_bounds = array<i64: 1, 3>, scalar_prefetch = 0 : i64, scratch_operands = 1 : i64, tpu.core_type = #tpu.core_type<tc>, window_params = [{transform_indices = @transform_0, window_bounds = array<i64: 16, 128>}, {transform_indices = @transform_1, window_bounds = array<i64: 1, 128, 128>}, {transform_indices = @transform_2, window_bounds = array<i64: 1, 1, 128>}, {transform_indices = @transform_3, window_bounds = array<i64: 1, 16, 128>}]} {
    %c0_i32 = arith.constant 0 : i32
    %0 = arith.cmpi eq, %arg1, %c0_i32 : i32
    %1 = arith.extui %0 : i1 to i32
    %c0_i32_0 = arith.constant 0 : i32
    %2 = arith.cmpi ne, %1, %c0_i32_0 : i32
    scf.if %2 {
      %c0_17 = arith.constant 0 : index
      %c0_18 = arith.constant 0 : index
      %29 = vector.load %arg2[%c0_17, %c0_18] : memref<16x128xf32, #tpu.memory_space<vmem>>, vector<16x128xf32>
      %c0_19 = arith.constant 0 : index
      %c0_20 = arith.constant 0 : index
      %30 = vector.load %arg6[%c0_19, %c0_20] : memref<16x128xf32, #tpu.memory_space<vmem>>, vector<16x128xf32>
      tpu.vector_store %arg6[%c0_19, %c0_20], %29 {strides = array<i32>} : memref<16x128xf32, #tpu.memory_space<vmem>>, vector<16x128xf32>,
    } else {
    }
    %c0 = arith.constant 0 : index
    %c0_1 = arith.constant 0 : index
    %3 = vector.load %arg6[%c0, %c0_1] : memref<16x128xf32, #tpu.memory_space<vmem>>, vector<16x128xf32>
    %4 = arith.truncf %3 : vector<16x128xf32> to vector<16x128xbf16>
    %c0_2 = arith.constant 0 : index
    %c0_3 = arith.constant 0 : index
    %c0_4 = arith.constant 0 : index
    %5 = vector.load %arg3[%c0_2, %c0_3, %c0_4] : memref<1x128x128xbf16, #tpu.memory_space<vmem>>, vector<1x128x128xbf16>
    %6 = vector.shape_cast %5 : vector<1x128x128xbf16> to vector<128x128xbf16>
    %cst = arith.constant dense<0.000000e+00> : vector<16x128xf32>
    %7 = tpu.matmul %4, %6, %cst {dimension_numbers = #tpu.dot_dimension_numbers<[1], [0], [0], [1], [0, 0, 1, 1], [], []>} : vector<16x128xbf16>, vector<128x128xbf16>, vector<16x128xf32> -> vector<16x128xf32>
    %c0_5 = arith.constant 0 : index
    %c0_6 = arith.constant 0 : index
    %c0_7 = arith.constant 0 : index
    %8 = vector.load %arg4[%c0_5, %c0_6, %c0_7] : memref<1x1x128xf32, #tpu.memory_space<vmem>>, vector<1x1x128xf32>
    %9 = vector.shape_cast %8 : vector<1x1x128xf32> to vector<1x128xf32>
    %10 = vector.broadcast %9 : vector<1x128xf32> to vector<16x128xf32>
    %11 = arith.addf %7, %10 : vector<16x128xf32>
    %12 = arith.mulf %11, %11 : vector<16x128xf32>
    %13 = arith.mulf %11, %12 : vector<16x128xf32>
    %cst_8 = arith.constant 4.471500e-02 : f32
    %14 = vector.broadcast %cst_8 : f32 to vector<16x128xf32>
    %15 = arith.mulf %14, %13 : vector<16x128xf32>
    %16 = arith.addf %11, %15 : vector<16x128xf32>
    %cst_9 = arith.constant 0.797884583 : f32
    %17 = vector.broadcast %cst_9 : f32 to vector<16x128xf32>
    %18 = arith.mulf %17, %16 : vector<16x128xf32>
    %19 = math.tanh %18 : vector<16x128xf32>
    %cst_10 = arith.constant 1.000000e+00 : f32
    %20 = vector.broadcast %cst_10 : f32 to vector<16x128xf32>
    %21 = arith.addf %20, %19 : vector<16x128xf32>
    %cst_11 = arith.constant 5.000000e-01 : f32
    %22 = vector.broadcast %cst_11 : f32 to vector<16x128xf32>
    %23 = arith.mulf %22, %21 : vector<16x128xf32>
    %24 = arith.mulf %11, %23 : vector<16x128xf32>
    %c0_12 = arith.constant 0 : index
    %c0_13 = arith.constant 0 : index
    %25 = vector.load %arg6[%c0_12, %c0_13] : memref<16x128xf32, #tpu.memory_space<vmem>>, vector<16x128xf32>
    tpu.vector_store %arg6[%c0_12, %c0_13], %24 {strides = array<i32>} : memref<16x128xf32, #tpu.memory_space<vmem>>, vector<16x128xf32>,
    %c0_14 = arith.constant 0 : index
    %c0_15 = arith.constant 0 : index
    %c0_16 = arith.constant 0 : index
    %26 = vector.load %arg5[%c0_14, %c0_15, %c0_16] : memref<1x16x128xf32, #tpu.memory_space<vmem>>, vector<1x16x128xf32>
    %27 = vector.shape_cast %26 : vector<1x16x128xf32> to vector<16x128xf32>
    %28 = vector.shape_cast %24 : vector<16x128xf32> to vector<1x16x128xf32>
    tpu.vector_store %arg5[%c0_14, %c0_15, %c0_16], %28 {strides = array<i32>} : memref<1x16x128xf32, #tpu.memory_space<vmem>>, vector<1x16x128xf32>,
    return
  }
  func.func @transform_0(%arg0: i32, %arg1: i32) -> (i32, i32) {
    %c0_i32 = arith.constant 0 : i32
    %c0_i32_0 = arith.constant 0 : i32
    return %arg0, %c0_i32 : i32, i32
  }
  func.func @transform_1(%arg0: i32, %arg1: i32) -> (i32, i32, i32) {
    %c0_i32 = arith.constant 0 : i32
    %c0_i32_0 = arith.constant 0 : i32
    %c0_i32_1 = arith.constant 0 : i32
    return %arg1, %c0_i32, %c0_i32_0 : i32, i32, i32
  }
  func.func @transform_2(%arg0: i32, %arg1: i32) -> (i32, i32, i32) {
    %c0_i32 = arith.constant 0 : i32
    %c0_i32_0 = arith.constant 0 : i32
    %c0_i32_1 = arith.constant 0 : i32
    return %arg1, %c0_i32, %c0_i32_0 : i32, i32, i32
  }
  func.func @transform_3(%arg0: i32, %arg1: i32) -> (i32, i32, i32) {
    %c0_i32 = arith.constant 0 : i32
    %c0_i32_0 = arith.constant 0 : i32
    return %arg1, %arg0, %c0_i32 : i32, i32, i32
  }
}

</mosaic_0001>

<bundles_post_ra>
// kernel: tpu_custom_call.1
= control target key start
LH: loop header
LB: loop body
LE: loop exit
PB: predicated region body
PF: predicated region fallthrough
CT: control target
= control target key end

     0   :  { %8 = vsyncpa [#allocation4], 0  ;;  %s1042_s0 = inlined_call_operand.hbm [shape: f32[16,128], index: 0, kind: input, shape index: {}]   ;;  %s1043_s1 = inlined_call_operand.hbm [shape: bf16[3,128,128], index: 1, kind: input, shape index: {}]   ;;  %s1044_s2 = inlined_call_operand.vmem [shape: f32[3,1,128], index: 2, kind: input, shape index: {}]   ;;  %s1045_s3 = inlined_call_operand.hbm [shape: f32[3,16,128], index: 3, kind: output, shape index: {}]  }
   0x1   :  { %9 = vsyncpa [#allocation7], 0 }
   0x2   :  { %11 = vsyncpa [#allocation7 + $0x1], 0 }
   0x3   :  { %12 = vsyncpa [#allocation5], 0 }
   0x4   :  { %14 = vsyncpa [#allocation5 + $0x1], 0  ;;  %s833_s12 = smov 0   ;;  %s835_s13 = smov 0  }
   0x5   :  { %s837_s14 = smov 0   ;;  %s839_s15 = smov 0  }
   0x6   :  { %s841_s16 = smov 0   ;;  %s843_s17 = smov 0  }
   0x7 LB: > { %s511_s18 = sadd.s32 4294967295, %s800_s17   ;;  %s512_s19 = sadd.s32 4294967294, %s800_s17   ;;  %s800_s17 = sphi %s843_s17, %s20_s17   ;;  %s796_s16 = sphi %s841_s16, %s1062_s16   ;;  %s792_s15 = sphi %s839_s15, %s1061_s15   ;;  %s788_s14 = sphi %s837_s14, %s1060_s14   ;;  %s784_s13 = sphi %s835_s13, %s1059_s13   ;;  %s780_s12 = sphi %s833_s12, %s1058_s12  }
   0x8   : > { %p78_p0 = scmp.ne.s32.totalorder %s784_s13, %s780_s12  ;;  %p867_p1 = scmp.eq.s32.totalorder %s511_s18, 0 }
   0x9   : > { %p871_p2 = scmp.eq.s32.totalorder %s511_s18, 2  ;;  %p136_p3 = scmp.eq.s32.totalorder %s512_s19, 2 }
   0xa   : > { %p877_p4 = por %p867_p1, %p78_p0  ;;  %p513_p5 = scmp.ge.s32.totalorder %s800_s17, 1 }
   0xb   : > { %p882_p6 = por %p136_p3, %p78_p0  ;;  %p143_p7 = scmp.lt.s32.totalorder %s800_s17, 4 }
   0xc   : > { %s802_s25 = smov [#allocation3]   ;;  %s29_s28 = sadd.s32 1, %s796_s16 }
   0xd   : > { %s1050_s23 = scalar_select %p882_p6, 1, 0 }
   0xe   : > { %p887_p8 = pnand %p513_p5, %p143_p7  ;;  %s158_s26 = sshll.u32 %s802_s25, 4  ;;  %s159_s26 = int_to_ptr.vmem [resolvable:$true] %s158_s26 }
   0xf   : > { %s673_s29 = scalar_lea.vmem %s159_s26, 256  ;;  %p681_p3 = scmp.lt.s32.totalorder %s159_s26, %s159_s26 }
  0x10   : > { %p577_p9 = pneg %p887_p8  ;;  %p674_p12 = scmp.ne.s32.totalorder %s159_s26, %s673_s29 }
  0x11   : > { %p682_p5 = scmp.lt.s32.totalorder %s673_s29, %s673_s29 }
  0x12   : > { %p895_p10 = pnand %p577_p9, %p867_p1 }
  0x13   : > { %p683_p7 = por %p682_p5, %p681_p3 }
  0x14   : > { %p664_p11 = pneg %p895_p10 }
  0x16   : > { %p676_p13 = pnand %p674_p12, %p664_p11 }
  0x18   : > { %p677_p0 = pneg %p676_p13 }
  0x1a   : > { %p684_p6 = pnand %p683_p7, %p677_p0 }
  0x1c   : > { %687 = shalt.err (!%p684_p6)
}
  0x1d   : > { %s803_s30 = smov 128   ;;  %s804_s4 = smov 8  }
  0x1e   : > { %580 = dma.hbm_to_vmem [thread:$0]  (!%p895_p10), %s1042_s0, 256, %s159_s26, [#allocation4], %s803_s30, %s803_s30, %s804_s4  }
  0x1f   : > { %p30_p9 = scmp.ge.s32.totalorder %s29_s28, 3  ;;  %s65_s7 = sadd.s32 1, %s788_s14 }
  0x20   : > { %p72_p6 = scmp.ne.s32.totalorder %s788_s14, %s784_s13  ;;  %p73_p11 = scmp.eq.s32.totalorder %s800_s17, 0 }
  0x21   : > { %s1064_s28 = smov (%p30_p9, %s29_s28), 0  ;;  %p590_p0 = scmp.lt.s32.totalorder %s800_s17, 3 }
  0x22   : > { %p913_p12 = por %p73_p11, %p72_p6  ;;  %p919_p13 = por %p871_p2, %p72_p6 }
  0x23   : > { %s62_s10 = ssub.s32 %s796_s16, %s1064_s28  ;;  %s172_s11 = sand.u32 1, %s788_s14  }
  0x24   : > { %s1054_s9 = scalar_select %p919_p13, 1, 0 }
  0x25   : > { %p63_p10 = scmp.eq.s32.totalorder %s62_s10, 0  ;;  %s516_s18 = sshll.u32 %s172_s11, 6 }
  0x26   : > { %s538_s25 = sshll.u32 %s796_s16, 10  ;;  %s176_s30 = scalar_lea.vmem [#allocation6], %s516_s18 }
  0x27   : > { %s928_s19 = scalar_select %p63_p10, %s788_s14, %s65_s7  }
  0x28   : > { %s182_s29 = scalar_lea.hbm %s1043_s1, %s538_s25  ;;  %s183_s4 = sshll.u32 %s176_s30, 4  ;;  %s184_s4 = int_to_ptr.vmem [resolvable:$true] %s183_s4 }
  0x29   : > { %p936_p2 = pnand %p590_p0, %p913_p12  ;;  %s173_s5 = scalar_lea.sflag [#allocation7], %s172_s11 }
  0x2a   : > { %s701_s6 = scalar_lea.vmem %s184_s4, 1024  ;;  %s805_s7 = smov [#allocation6]  }
  0x2b   : > { %p690_p3 = pneg %p936_p2  ;;  %p702_p5 = scmp.ne.s32.totalorder %s184_s4, %s701_s6 }
  0x2c   : > { %s706_s10 = sshll.u32 %s805_s7, 4  ;;  %s707_s10 = int_to_ptr.vmem [resolvable:$false] %s706_s10 }
  0x2d   : > { %p704_p7 = pnand %p702_p5, %p690_p3  ;;  %s708_s25 = scalar_lea.vmem %s707_s10, 2048 }
  0x2e   : > { %p709_p6 = scmp.lt.s32.totalorder %s184_s4, %s707_s10  ;;  %p710_p11 = scmp.lt.s32.totalorder %s708_s25, %s701_s6 }
  0x2f   : > { %p705_p9 = pneg %p704_p7 }
  0x30   : > { %p711_p10 = por %p710_p11, %p709_p6 }
  0x32   : > { %p712_p13 = pnand %p711_p10, %p705_p9 }
  0x34   : > { %715 = shalt.err (!%p712_p13)
}
  0x35   : > { %s806_s8 = smov 64   ;;  %s807_s18 = smov 4  }
  0x36   : > { %584 = dma.hbm_to_vmem [thread:$0]  (!%p936_p2), %s182_s29, 1024, %s184_s4, %s173_s5, %s806_s8, %s806_s8, %s807_s18  }
  0x37   : > { %201 = sbr.rel (%p887_p8) target bundleno = 351 (0x15f), region = 32 }
  0x3c   : > { %767 = dma.done.wait (%p867_p1), [#allocation4], 256  }
  0x3d   : > { %769 = vsyncadd (%p867_p1), [#allocation4], 4294967040  ;;  %s951_s11 = sand.u32 1, %s784_s13  }
  0x3e   : > { %s521_s26 = sshll.u32 %s951_s11, 6  ;;  %s208_s27 = scalar_lea.sflag [#allocation7], %s951_s11 }
  0x3f   : > { %s955_s30 = scalar_lea.vmem [#allocation6], %s521_s26 }
  0x40   : > { %771 = dma.done.wait (%p877_p4), %s208_s27, 1024  }
  0x41   : > { %773 = vsyncadd (%p877_p4), %s208_s27, 4294966272  ;;  %s522_s20 = sshll.u32 %s951_s11, 4  ;;  %p238_p1 = scmp.lt.s32.totalorder %s792_s15, 2 }
  0x42   : > { %s970_s5 = scalar_lea.vmem [#allocation8], %s522_s20  ;;  %p523_p8 = scmp.ne.s32.totalorder %s792_s15, 0 }
  0x43   : > { %s964_s24 = scalar_select %p238_p1, %s792_s15, 2 }
  0x44   : > { %246 = sbr.rel (%p523_p8) target bundleno = 75 (0x4b), region = 44 }
  0x45   : > { %s240_s21 = scalar_lea.vmem %s1044_s2, %s964_s24 }
  0x49   : > { %v247_v0 = vld [vmem:[#allocation3] sm:$0xff]  ;;  %v248_v1 = vld [vmem:[#allocation3 + $0x8] sm:$0xff] }
  0x4a   : > { %249 = vst [vmem:[#allocation2] sm:$0xff] %v247_v0  ;;  %250 = vst [vmem:[#allocation2 + $0x8] sm:$0xff] %v248_v1 }
  0x4b PF: > { %v650_v2 = vld [vmem:[%s955_s30 + $0x38] sm:$0xff]   ;;  %v808_v3 = vmov 0.0   ;;  %v651_v4 = vld [vmem:[%s955_s30 + $0x30] sm:$0xff]   ;;  %vm809_vm0 = vmmov 0   ;;  %v652_v5 = vld [vmem:[%s955_s30 + $0x28] sm:$0xff]   ;;  %s539_s7 = sshll.u32 %s792_s15, 8 }
  0x4c   : > { %549 = vmatprep.subr.bf16.mxu0 %v808_v3  ;;  %565 = vmatprep.mubr.msk.bf16.mxu0 %vm809_vm0, %v808_v3  ;;  %v653_v6 = vld [vmem:[%s955_s30 + $0x20] sm:$0xff]   ;;  %v654_v7 = vld [vmem:[%s955_s30 + $0x18] sm:$0xff]   ;;  %v655_v8 = vld [vmem:[%s955_s30 + $0x10] sm:$0xff]   ;;  %s404_s10 = sshll.u32 %s970_s5, 4  ;;  %s992_s18 = scalar_lea.hbm %s1045_s3, %s539_s7  ;;  %s994_s10 = int_to_ptr.vmem [resolvable:$true] %s404_s10 }
  0x4d   : > { %550 = vmatpush3.bf16.msra.mxu0 %v650_v2  ;;  %v656_v9 = vld [vmem:[%s955_s30 + $0x8] sm:$0xff]   ;;  %v657_v10 = vld [vmem:[%s955_s30] sm:$0xff]   ;;  %s389_s26 = scalar_lea.sflag [#allocation5], %s951_s11  ;;  %s716_s27 = scalar_lea.vmem %s994_s10, 256 }
  0x4e   : > { %551 = vmatprep.subr.bf16.mxu0 %v808_v3  ;;  %v524_v14 = vld [vmem:[%s240_s21] ss:$0 sm:$0xff]  ;;  %p717_p4 = scmp.ne.s32.totalorder %s994_s10, %s716_s27  ;;  %p1056_p12 = scmp.ne.s32.totalorder %s1054_s9, 0 }
  0x4f   : > { %s810_s15 = smov [#allocation8]  }
  0x50   : > { %p718_p13 = pnand %p717_p4, %p1056_p12  ;;  %s720_s30 = sshll.u32 %s810_s15, 4  ;;  %s721_s30 = int_to_ptr.vmem [resolvable:$false] %s720_s30 }
  0x51   : > { %552 = vmatpush3.bf16.msra.mxu0 %v651_v4  ;;  %v251_v11 = vld [vmem:[#allocation2] sm:$0xff]  ;;  %v252_v12 = vld [vmem:[#allocation2 + $0x8] sm:$0xff]  ;;  %s722_s20 = scalar_lea.vmem %s721_s30, 512  ;;  %p723_p2 = scmp.lt.s32.totalorder %s994_s10, %s721_s30 }
  0x52   : > { %553 = vmatprep.subr.bf16.mxu0 %v808_v3  ;;  %v253_v13 = vpack.c.bf16 %v252_v12, %v251_v11  ;;  %p719_p0 = pneg %p718_p13  ;;  %p724_p3 = scmp.lt.s32.totalorder %s722_s20, %s716_s27 }
  0x54   : > { %p725_p5 = por %p724_p3, %p723_p2 }
  0x55   : > { %554 = vmatpush3.bf16.msra.mxu0 %v652_v5 }
  0x56   : > { %555 = vmatprep.subr.bf16.mxu0 %v808_v3  ;;  %p726_p7 = pnand %p725_p5, %p719_p0 }
  0x59   : > { %556 = vmatpush3.bf16.msra.mxu0 %v653_v6 }
  0x5a   : > { %557 = vmatprep.subr.bf16.mxu0 %v808_v3 }
  0x5d   : > { %558 = vmatpush3.bf16.msra.mxu0 %v654_v7 }
  0x5e   : > { %559 = vmatprep.subr.bf16.mxu0 %v808_v3 }
  0x61   : > { %560 = vmatpush3.bf16.msra.mxu0 %v655_v8 }
  0x62   : > { %561 = vmatprep.subr.bf16.mxu0 %v808_v3 }
  0x65   : > { %562 = vmatpush3.bf16.msra.mxu0 %v656_v9 }
  0x66   : > { %563 = vmatprep.subr.bf16.mxu0 %v808_v3 }
  0x69   : > { %564 = vmatpush3.bf16.msra.mxu0 %v657_v10 }
  0x6c   : > { %566 = vmatmul.mubr.bf16.vlgmr.msra.gmra.mxu0 %v253_v13 }
 0x12c   : > { %v359_v15 = vpop.f32.mrf.mxu0 }
 0x12d   : > { %v360_v16 = vadd.f32 %v524_v14, %v359_v15 }
 0x12e   : > { %v567_v17 = vpop.f32.mrf.mxu0 }
 0x12f   : > { %v366_v18 = vmul.f32 %v360_v16, %v360_v16 }
 0x130   : > { %v362_v19 = vpop.f32.mrf.mxu0 }
 0x131   : > { %v368_v20 = vmul.f32 %v366_v18, %v360_v16  ;;  %v363_v21 = vadd.f32 %v524_v14, %v362_v19 }
 0x132   : > { %v568_v22 = vpop.f32.mrf.mxu0 }
 0x133   : > { %v370_v23 = vmul.f32 0.044715, %v368_v20  ;;  %v367_v24 = vmul.f32 %v363_v21, %v363_v21 }
 0x135   : > { %v372_v25 = vadd.f32 %v370_v23, %v360_v16  ;;  %v369_v26 = vmul.f32 %v367_v24, %v363_v21 }
 0x137   : > { %v374_v27 = vmul.f32 0.7978846, %v372_v25  ;;  %v371_v28 = vmul.f32 0.044715, %v369_v26 }
 0x139   : > { %658 = vtanh.f32 %v374_v27  ;;  %v373_v29 = vadd.f32 %v371_v28, %v363_v21 }
 0x13b   : > { %v375_v30 = vmul.f32 0.7978846, %v373_v29 }
 0x13d   : > { %660 = vtanh.f32 %v375_v30 }
 0x146   : > { %v659_v31 = vpop.eup %658 }
 0x147   : > { %v378_v32 = vadd.f32 1.0, %v659_v31 }
 0x149   : > { %v380_v33 = vmul.f32 0.5, %v378_v32 }
 0x14a   : > { %v661_v34 = vpop.eup %660 }
 0x14b   : > { %v382_v35 = vmul.f32 %v380_v33, %v360_v16  ;;  %v379_v36 = vadd.f32 1.0, %v661_v34 }
 0x14d   : > { %384 = vst [vmem:[#allocation2] sm:$0xff] %v382_v35  ;;  %386 = vst [vmem:[%s970_s5] sm:$0xff] %v382_v35  ;;  %v381_v37 = vmul.f32 0.5, %v379_v36 }
 0x14f   : > { %v383_v38 = vmul.f32 %v381_v37, %v363_v21 }
 0x151   : > { %385 = vst [vmem:[#allocation2 + $0x8] sm:$0xff] %v383_v38  ;;  %387 = vst [vmem:[%s970_s5 + $0x8] sm:$0xff] %v383_v38 }
 0x152   : > { %729 = shalt.err (!%p726_p7)
}
 0x153   : > { %s730_s24 = scalar_lea.hbm %s992_s18, 256  ;;  %s734_s21 = scalar_lea.hbm %s1045_s3, 768 }
 0x154   : > { %p731_p9 = scmp.ne.s32.totalorder %s992_s18, %s730_s24  ;;  %p735_p10 = scmp.lt.s32.totalorder %s992_s18, %s1045_s3 }
 0x155   : > { %p736_p1 = scmp.lt.s32.totalorder %s734_s21, %s730_s24 }
 0x156   : > { %p732_p6 = pnand %p731_p9, %p1056_p12 }
 0x157   : > { %p737_p8 = por %p736_p1, %p735_p10 }
 0x158   : > { %p733_p11 = pneg %p732_p6 }
 0x15a   : > { %p738_p4 = pnand %p737_p8, %p733_p11 }
 0x15c   : > { %741 = shalt.err (!%p738_p4)
}
 0x15d   : > { %s811_s6 = smov 128   ;;  %s812_s7 = smov 8  }
 0x15e   : > { %575 = dma.vmem_to_hbm [thread:$0]  (%p1056_p12), %s994_s10, 256, %s992_s18, %s389_s26, %s811_s6, %s811_s6, %s812_s7  }
 0x15f PF: > { %p592_p13 = scmp.ge.s32.totalorder %s800_s17, 2  ;;  %s419_s25 = sand.u32 1, %s780_s12  }
 0x160   : > { %p1057_p0 = scmp.ne.s32.totalorder %s1050_s23, 0  ;;  %s420_s8 = scalar_lea.sflag [#allocation5], %s419_s25 }
 0x162   : > { %p586_p2 = pnand %p592_p13, %p1057_p0 }
 0x164   : > { %p587_p3 = pneg %p586_p2 }
 0x166   : > { %775 = dma.done.wait (%p587_p3), %s420_s8, 256  }
 0x167   : > { %777 = vsyncadd (%p587_p3), %s420_s8, 4294967040  ;;  %s20_s17 = sadd.s32 1, %s800_s17   ;;  %s1058_s12 = smov %s784_s13 }
 0x168   : > { %p17_p5 = scmp.ge.s32.totalorder %s20_s17, 5   ;;  %s1059_s13 = smov %s788_s14 }
 0x169   : > { %s1060_s14 = smov %s928_s19  ;;  %s1061_s15 = smov %s796_s16 }
 0x16a   : > { %s1062_s16 = smov %s1064_s28  ;;  %19 = sbr.rel (!%p17_p5) target bundleno = 7 (0x7), region = 90 }
 0x16f   :  { %425 = vsyncpa [#allocation4], 1 }
 0x170   :  { %427 = vsyncpa [#allocation4 + $0x1], 1 }
 0x171   :  { %428 = vsyncpa [#allocation7], 1 }
 0x172   :  { %430 = vsyncpa [#allocation7 + $0x1], 1 }
 0x173   :  { %431 = vsyncpa [#allocation5], 1 }
 0x174   :  { %433 = vsyncpa [#allocation5 + $0x1], 1 }

</bundles_post_ra>
